<compile_context>
chip_gen: v7x
topology: tpu7x:2x2x1
jax: 0.10.0
libtpu: 0.0.40
codegen_flags: <defaults>
</compile_context>

<pallas_src>
import math

import jax
import jax.numpy as jnp
from jax import lax
from jax.experimental import pallas as pl
from jax.experimental.pallas import tpu as pltpu


def _round_up(x, m):
    return ((x + m - 1) // m) * m


def _cdiv(a, b):
    return (a + b - 1) // b


def _make_loss_kernel(eta, gamma, alpha, n_actions, n_agents, n_states,
                      n_samples, l_tile):
    A, G, S = n_actions, n_agents, n_states
    LT = l_tile
    log_inv_L = math.log(1.0 / n_samples)
    NEG = -1e30  # finite "minus infinity": masked lanes never create NaNs

    def kernel(lhs_ref, si_ref, rsum_ref, out_ref, m_acc, se_acc):
        c = pl.program_id(0)          # parallel chunk (v7x: per-TensorCore)
        t = pl.program_id(1)          # sequential tile inside the chunk
        T = pl.num_programs(1)

        @pl.when(t == 0)
        def _():
            m_acc[...] = jnp.full((1, LT), NEG, jnp.float32)
            se_acc[...] = jnp.zeros((1, LT), jnp.float32)

        si = si_ref[...]                      # (3G, LT) int32: [s; a; s']
        s = si[0:G, :]
        a_raw = si[G:2 * G, :]
        a = jnp.where(a_raw == -1, 0, a_raw)  # in-kernel a[a == -1] = 0
        sp = si[2 * G:3 * G, :]
        r_sum = rsum_ref[...]                 # (1, LT) f32, pre-summed rewards

        # ---- stacked one-hot (2*G*S, LT): rows [g*S..] one-hot of s'[g],
        #      rows [G*S + g*S..] one-hot of s[g].  Each block is ONE compare,
        #      written once (no accumulate chain).
        iota_s = lax.broadcasted_iota(jnp.int32, (S, LT), 0)
        oh = jnp.concatenate(
            [(iota_s == sp[g:g + 1, :]).astype(jnp.float32) for g in range(G)]
            + [(iota_s == s[g:g + 1, :]).astype(jnp.float32) for g in range(G)],
            axis=0)                                             # (2GS, LT)

        # ---- single MXU matmul: rows 0..A-1 -> alpha*q_sp + log pi_sp,
        #      rows A.. -> Qs[g*A+act] = q_table[act, g, s[g,l]]
        y = jnp.dot(lhs_ref[...], oh,
                    preferred_element_type=jnp.float32)          # (A+A*G, LT)
        z = y[0:A, :]                                            # (A, LT)
        qs = y[A:, :]                                            # (A*G, LT)

        # value(pi, q, s')  = (1/alpha) * logsumexp_a(alpha*q + log pi)
        m_z = jnp.max(z, axis=0, keepdims=True)
        val_sp = (1.0 / alpha) * (m_z + jnp.log(
            jnp.sum(jnp.exp(z - m_z), axis=0, keepdims=True)))   # (1, LT)

        # Q(s, a) summed over agents: A*G cheap compare-selects + sublane sum
        iota_a = lax.broadcasted_iota(jnp.int32, (A, LT), 0)
        amask = jnp.concatenate(
            [(iota_a == a[g:g + 1, :]).astype(jnp.float32) for g in range(G)],
            axis=0)                                              # (A*G, LT)
        q_sa = jnp.sum(amask * qs, axis=0, keepdims=True)        # (1, LT)

        # logistic Bellman error
        delta_q = r_sum + gamma * val_sp - q_sa                  # (1, LT)

        # masked, LANE-WIDE online logsumexp (no per-tile cross-lane reduce)
        lane = lax.broadcasted_iota(jnp.int32, (1, LT), 1)
        gidx = (c * T + t) * LT + lane
        x = jnp.where(gidx < n_samples, eta * delta_q + log_inv_L, NEG)

        m_old = m_acc[...]
        m_new = jnp.maximum(m_old, x)
        se_acc[...] = se_acc[...] * jnp.exp(m_old - m_new) + jnp.exp(x - m_new)
        m_acc[...] = m_new

        @pl.when(t == T - 1)
        def _():
            # per-chunk finalize: the only cross-lane reduction
            mm = m_acc[...]
            m_tot = jnp.max(mm, axis=1, keepdims=True)                   # (1,1)
            se_tot = jnp.sum(se_acc[...] * jnp.exp(mm - m_tot),
                             axis=1, keepdims=True)                      # (1,1)
            lse = m_tot + jnp.log(se_tot)                                # (1,1)
            out_ref[...] = jnp.broadcast_to(lse, (8, 128))

    return kernel


def loss_pallas(q_table, samples, pi, v0, *, eta, gamma, alpha,
                l_tile=4096, num_chunks=2):
    """samples: (4, n_agents, n_samples) = [s, a, s', r]; v0: (n_states,)."""
    A, G, S = pi.shape
    GS = G * S
    n_samples = int(samples.shape[2])

    q32 = q_table.astype(jnp.float32)
    # log-space policy (clamped so the one-hot matmul never sees -inf * 0)
    lp = jnp.log(jnp.maximum(pi.astype(jnp.float32), 1e-30))

    # ---- constant LHS (A + A*G, 2*GS), built once per call -----------------
    # rows 0..A-1, cols 0..GS-1   : alpha*q_table + log pi   (value over s')
    # rows A.. ,   cols GS..2GS-1 : block-diagonal q_table   (Q(s,a) gather)
    z_rows = (float(alpha) * q32 + lp).reshape(A, GS)
    bd = jnp.zeros((A * G, GS), jnp.float32)
    for g in range(G):
        bd = bd.at[g * A:(g + 1) * A, g * S:(g + 1) * S].set(q32[:, g, :])
    lhs = jnp.zeros((A + A * G, 2 * GS), jnp.float32)
    lhs = lhs.at[0:A, 0:GS].set(z_rows)
    lhs = lhs.at[A:, GS:].set(bd)

    # ---- sample-axis tiling: NC parallel chunks x T sequential tiles -------
    LT = min(int(l_tile), _round_up(n_samples, 128))
    n_tiles = _cdiv(n_samples, LT)
    NC = max(1, min(int(num_chunks), n_tiles))
    T = _cdiv(n_tiles, NC)
    L_pad = NC * T * LT
    pad = L_pad - n_samples

    s = samples[0].astype(jnp.int32)
    a = samples[1].astype(jnp.int32)   # -1 -> 0 fix-up happens in-kernel
    sp = samples[2].astype(jnp.int32)
    si = jnp.pad(jnp.concatenate([s, a, sp], axis=0), ((0, 0), (0, pad)))
    r_sum = jnp.pad(samples[3].astype(jnp.float32).sum(axis=0, keepdims=True),
                    ((0, 0), (0, pad)))

    kernel = _make_loss_kernel(float(eta), float(gamma), float(alpha),
                               A, G, S, n_samples, LT)

    out = pl.pallas_call(
        kernel,
        out_shape=jax.ShapeDtypeStruct((8, NC * 128), jnp.float32),
        grid=(NC, T),
        in_specs=[
            pl.BlockSpec((A + A * G, 2 * GS), lambda c, t: (0, 0)),
            pl.BlockSpec((3 * G, LT), lambda c, t: (0, c * T + t)),
            pl.BlockSpec((1, LT), lambda c, t: (0, c * T + t)),
        ],
        out_specs=pl.BlockSpec((8, 128), lambda c, t: (0, c)),
        scratch_shapes=[pltpu.VMEM((1, LT), jnp.float32),   # running max
                        pltpu.VMEM((1, LT), jnp.float32)],  # running sum-exp
        compiler_params=pltpu.CompilerParams(
            dimension_semantics=("parallel", "arbitrary")),
    )(lhs, si, r_sum)

    # combine per-chunk partial logsumexps (tiny)
    chunk_lse = out[0, 0::128]                               # (NC,)
    term1 = (1.0 / eta) * jax.scipy.special.logsumexp(chunk_lse)

    # ---- all-states epilogue (O(A*S), pure JAX in the wrapper) -------------
    z_all = float(alpha) * q32.sum(axis=1) + lp.sum(axis=1)  # (A, S)
    val_states = (1.0 / alpha) * jax.scipy.special.logsumexp(z_all, axis=0)
    term2 = (1.0 - gamma) * jnp.dot(v0.astype(jnp.float32), val_states)
    return term1 + term2


def loss_reference(q_table, samples, pi, v0, *, eta, gamma, alpha):
    """Pure-JAX reference mirroring the PyTorch module exactly."""
    s = samples[0]
    a = jnp.where(samples[1] == -1, 0, samples[1])
    sp = samples[2]
    r = samples[3].astype(jnp.float32)
    n_agents = pi.shape[1]
    n_states = pi.shape[2]
    L = s.shape[1]

    def value(states):
        q = 0.0
        p = 1.0
        for g in range(n_agents):
            q = q + q_table[:, g, states[g]]
            p = p * pi[:, g, states[g]]
        return (1.0 / alpha) * jax.scipy.special.logsumexp(
            alpha * q + jnp.log(p), axis=0)

    q_sa = 0.0
    for g in range(n_agents):
        q_sa = q_sa + q_table[a[g], g, s[g]]
    delta_q = r.sum(0) + gamma * value(sp) - q_sa

    state_tensor = jnp.tile(jnp.arange(n_states), (n_agents, 1))
    term1 = (1.0 / eta) * jax.scipy.special.logsumexp(
        eta * delta_q + jnp.log(1.0 / L))
    term2 = (1.0 - gamma) * jnp.dot(v0, value(state_tensor))
    return term1 + term2


if __name__ == "__main__":
    eta, gamma, alpha = 0.5, 0.9, 2.0
    n_actions, n_agents, n_states = 4, 3, 16

    key = jax.random.PRNGKey(0)
    k1, k2, k3, k4, k7 = jax.random.split(key, 5)

    q_table = jax.random.normal(k1, (n_actions, n_agents, n_states), jnp.float32)
    pi = jax.nn.softmax(
        jax.random.normal(k2, (n_actions, n_agents, n_states), jnp.float32), axis=0)
    v0 = jax.random.uniform(k7, (n_states,), jnp.float32)

    def make_samples(k, n_samples):
        ks, ka, kp, kr = jax.random.split(k, 4)
        s = jax.random.randint(ks, (n_agents, n_samples), 0, n_states, jnp.int32)
        # actions in [-1, n_actions); -1 exercises the a[a == -1] = 0 fix-up
        a = jax.random.randint(ka, (n_agents, n_samples), -1, n_actions, jnp.int32)
        sp = jax.random.randint(kp, (n_agents, n_samples), 0, n_states, jnp.int32)
        r = jax.random.randint(kr, (n_agents, n_samples), 0, 5, jnp.int32)
        return jnp.stack([s, a, sp, r], axis=0)

    # small case: single tile, single chunk
    samples_small = make_samples(k3, 8)
    out = jax.block_until_ready(loss_pallas(q_table, samples_small, pi, v0,
                                            eta=eta, gamma=gamma, alpha=alpha))
    ref = loss_reference(q_table, samples_small, pi, v0,
                         eta=eta, gamma=gamma, alpha=alpha)
    assert jnp.isfinite(out), "non-finite loss (small)"
    assert jnp.allclose(out, ref, rtol=1e-4, atol=1e-4), (out, ref)

    # larger case: exercises tiled online-logsumexp + 2-chunk parallel split
    samples_big = make_samples(k4, 1000)
    out2 = jax.block_until_ready(loss_pallas(q_table, samples_big, pi, v0,
                                             eta=eta, gamma=gamma, alpha=alpha,
                                             l_tile=128, num_chunks=2))
    ref2 = loss_reference(q_table, samples_big, pi, v0,
                          eta=eta, gamma=gamma, alpha=alpha)
    assert jnp.isfinite(out2), "non-finite loss (big)"
    assert jnp.allclose(out2, ref2, rtol=1e-4, atol=1e-4), (out2, ref2)

    print("KERNEL_OK")
</pallas_src>

<mosaic_0001>
module attributes {stable_mosaic.version = 11 : i64} {
  func.func @kernel(%arg0: i32, %arg1: i32, %arg2: memref<16x96xf32, #tpu.memory_space<vmem>>, %arg3: memref<9x128xi32, #tpu.memory_space<vmem>>, %arg4: memref<1x128xf32, #tpu.memory_space<vmem>>, %arg5: memref<8x128xf32, #tpu.memory_space<vmem>>, %arg6: memref<1x128xf32, #tpu.memory_space<vmem>>, %arg7: memref<1x128xf32, #tpu.memory_space<vmem>>) attributes {dimension_semantics = [#tpu.dimension_semantics<parallel>, #tpu.dimension_semantics<arbitrary>], iteration_bounds = array<i64: 1, 1>, scalar_prefetch = 0 : i64, scratch_operands = 2 : i64, tpu.core_type = #tpu.core_type<tc>, window_params = [{pipeline_mode = #tpu.pipeline_mode<synchronous>, transform_indices = @transform_0, window_bounds = array<i64: 16, 96>}, {transform_indices = @transform_1, window_bounds = array<i64: 9, 128>}, {transform_indices = @transform_2, window_bounds = array<i64: 1, 128>}, {transform_indices = @transform_3, window_bounds = array<i64: 8, 128>}]} {
    %c0_i32 = arith.constant 0 : i32
    %0 = arith.cmpi eq, %arg1, %c0_i32 : i32
    %1 = arith.extui %0 : i1 to i32
    %c0_i32_0 = arith.constant 0 : i32
    %2 = arith.cmpi ne, %1, %c0_i32_0 : i32
    scf.if %2 {
      %cst_25 = arith.constant -1.000000e+30 : f32
      %111 = vector.broadcast %cst_25 : f32 to vector<1x128xf32>
      %c0_26 = arith.constant 0 : index
      %c0_27 = arith.constant 0 : index
      %112 = vector.load %arg6[%c0_26, %c0_27] : memref<1x128xf32, #tpu.memory_space<vmem>>, vector<1x128xf32>
      tpu.vector_store %arg6[%c0_26, %c0_27], %111 {strides = array<i32>} : memref<1x128xf32, #tpu.memory_space<vmem>>, vector<1x128xf32>,
      %cst_28 = arith.constant 0.000000e+00 : f32
      %113 = vector.broadcast %cst_28 : f32 to vector<1x128xf32>
      %c0_29 = arith.constant 0 : index
      %c0_30 = arith.constant 0 : index
      %114 = vector.load %arg7[%c0_29, %c0_30] : memref<1x128xf32, #tpu.memory_space<vmem>>, vector<1x128xf32>
      tpu.vector_store %arg7[%c0_29, %c0_30], %113 {strides = array<i32>} : memref<1x128xf32, #tpu.memory_space<vmem>>, vector<1x128xf32>,
    } else {
    }
    %c0 = arith.constant 0 : index
    %c0_1 = arith.constant 0 : index
    %3 = vector.load %arg3[%c0, %c0_1] : memref<9x128xi32, #tpu.memory_space<vmem>>, vector<9x128xi32>
    %4 = vector.extract_strided_slice %3 {offsets = [0, 0], sizes = [3, 128], strides = [1, 1]} : vector<9x128xi32> to vector<3x128xi32>
    %5 = vector.extract_strided_slice %3 {offsets = [3, 0], sizes = [3, 128], strides = [1, 1]} : vector<9x128xi32> to vector<3x128xi32>
    %c-1_i32 = arith.constant -1 : i32
    %6 = vector.broadcast %c-1_i32 : i32 to vector<3x128xi32>
    %7 = arith.cmpi eq, %5, %6 : vector<3x128xi32>
    %c0_i32_2 = arith.constant 0 : i32
    %8 = vector.broadcast %c0_i32_2 : i32 to vector<3x128xi32>
    %9 = arith.select %7, %8, %5 : vector<3x128xi1>, vector<3x128xi32>
    %10 = vector.extract_strided_slice %3 {offsets = [6, 0], sizes = [3, 128], strides = [1, 1]} : vector<9x128xi32> to vector<3x128xi32>
    %c0_3 = arith.constant 0 : index
    %c0_4 = arith.constant 0 : index
    %11 = vector.load %arg4[%c0_3, %c0_4] : memref<1x128xf32, #tpu.memory_space<vmem>>, vector<1x128xf32>
    %12 = tpu.iota {dimensions = array<i32: 0>} : vector<16x128xi32>
    %13 = vector.extract_strided_slice %10 {offsets = [0, 0], sizes = [1, 128], strides = [1, 1]} : vector<3x128xi32> to vector<1x128xi32>
    %14 = vector.broadcast %13 : vector<1x128xi32> to vector<16x128xi32>
    %15 = arith.cmpi eq, %12, %14 : vector<16x128xi32>
    %16 = arith.extui %15 : vector<16x128xi1> to vector<16x128xi32>
    %17 = arith.sitofp %16 : vector<16x128xi32> to vector<16x128xf32>
    %18 = vector.extract_strided_slice %10 {offsets = [1, 0], sizes = [1, 128], strides = [1, 1]} : vector<3x128xi32> to vector<1x128xi32>
    %19 = vector.broadcast %18 : vector<1x128xi32> to vector<16x128xi32>
    %20 = arith.cmpi eq, %12, %19 : vector<16x128xi32>
    %21 = arith.extui %20 : vector<16x128xi1> to vector<16x128xi32>
    %22 = arith.sitofp %21 : vector<16x128xi32> to vector<16x128xf32>
    %23 = vector.extract_strided_slice %10 {offsets = [2, 0], sizes = [1, 128], strides = [1, 1]} : vector<3x128xi32> to vector<1x128xi32>
    %24 = vector.broadcast %23 : vector<1x128xi32> to vector<16x128xi32>
    %25 = arith.cmpi eq, %12, %24 : vector<16x128xi32>
    %26 = arith.extui %25 : vector<16x128xi1> to vector<16x128xi32>
    %27 = arith.sitofp %26 : vector<16x128xi32> to vector<16x128xf32>
    %28 = vector.extract_strided_slice %4 {offsets = [0, 0], sizes = [1, 128], strides = [1, 1]} : vector<3x128xi32> to vector<1x128xi32>
    %29 = vector.broadcast %28 : vector<1x128xi32> to vector<16x128xi32>
    %30 = arith.cmpi eq, %12, %29 : vector<16x128xi32>
    %31 = arith.extui %30 : vector<16x128xi1> to vector<16x128xi32>
    %32 = arith.sitofp %31 : vector<16x128xi32> to vector<16x128xf32>
    %33 = vector.extract_strided_slice %4 {offsets = [1, 0], sizes = [1, 128], strides = [1, 1]} : vector<3x128xi32> to vector<1x128xi32>
    %34 = vector.broadcast %33 : vector<1x128xi32> to vector<16x128xi32>
    %35 = arith.cmpi eq, %12, %34 : vector<16x128xi32>
    %36 = arith.extui %35 : vector<16x128xi1> to vector<16x128xi32>
    %37 = arith.sitofp %36 : vector<16x128xi32> to vector<16x128xf32>
    %38 = vector.extract_strided_slice %4 {offsets = [2, 0], sizes = [1, 128], strides = [1, 1]} : vector<3x128xi32> to vector<1x128xi32>
    %39 = vector.broadcast %38 : vector<1x128xi32> to vector<16x128xi32>
    %40 = arith.cmpi eq, %12, %39 : vector<16x128xi32>
    %41 = arith.extui %40 : vector<16x128xi1> to vector<16x128xi32>
    %42 = arith.sitofp %41 : vector<16x128xi32> to vector<16x128xf32>
    %43 = tpu.concatenate %17, %22, %27, %32, %37, %42 in 0 : vector<16x128xf32>, vector<16x128xf32>, vector<16x128xf32>, vector<16x128xf32>, vector<16x128xf32>, vector<16x128xf32> -> vector<96x128xf32>
    %c0_5 = arith.constant 0 : index
    %c0_6 = arith.constant 0 : index
    %44 = vector.load %arg2[%c0_5, %c0_6] : memref<16x96xf32, #tpu.memory_space<vmem>>, vector<16x96xf32>
    %cst = arith.constant dense<0.000000e+00> : vector<16x128xf32>
    %45 = tpu.matmul %44, %43, %cst {dimension_numbers = #tpu.dot_dimension_numbers<[1], [0], [0], [1], [0, 0, 1, 1], [], []>} : vector<16x96xf32>, vector<96x128xf32>, vector<16x128xf32> -> vector<16x128xf32>
    %46 = vector.extract_strided_slice %45 {offsets = [0, 0], sizes = [4, 128], strides = [1, 1]} : vector<16x128xf32> to vector<4x128xf32>
    %47 = vector.extract_strided_slice %45 {offsets = [4, 0], sizes = [12, 128], strides = [1, 1]} : vector<16x128xf32> to vector<12x128xf32>
    %cst_7 = arith.constant dense<0xFF800000> : vector<128xf32>
    %48 = vector.multi_reduction <maximumf>, %46, %cst_7 [0] : vector<4x128xf32> to vector<128xf32>
    %49 = vector.shape_cast %48 : vector<128xf32> to vector<1x128xf32>
    %50 = vector.broadcast %49 : vector<1x128xf32> to vector<4x128xf32>
    %51 = arith.subf %46, %50 : vector<4x128xf32>
    %52 = math.exp %51 : vector<4x128xf32>
    %cst_8 = arith.constant dense<0.000000e+00> : vector<128xf32>
    %53 = vector.multi_reduction <add>, %52, %cst_8 [0] : vector<4x128xf32> to vector<128xf32>
    %54 = vector.shape_cast %53 : vector<128xf32> to vector<1x128xf32>
    %55 = math.log %54 : vector<1x128xf32>
    %56 = arith.addf %49, %55 : vector<1x128xf32>
    %cst_9 = arith.constant 5.000000e-01 : f32
    %57 = vector.broadcast %cst_9 : f32 to vector<1x128xf32>
    %58 = arith.mulf %57, %56 : vector<1x128xf32>
    %59 = tpu.iota {dimensions = array<i32: 0>} : vector<4x128xi32>
    %60 = vector.extract_strided_slice %9 {offsets = [0, 0], sizes = [1, 128], strides = [1, 1]} : vector<3x128xi32> to vector<1x128xi32>
    %61 = vector.broadcast %60 : vector<1x128xi32> to vector<4x128xi32>
    %62 = arith.cmpi eq, %59, %61 : vector<4x128xi32>
    %63 = arith.extui %62 : vector<4x128xi1> to vector<4x128xi32>
    %64 = arith.sitofp %63 : vector<4x128xi32> to vector<4x128xf32>
    %65 = vector.extract_strided_slice %9 {offsets = [1, 0], sizes = [1, 128], strides = [1, 1]} : vector<3x128xi32> to vector<1x128xi32>
    %66 = vector.broadcast %65 : vector<1x128xi32> to vector<4x128xi32>
    %67 = arith.cmpi eq, %59, %66 : vector<4x128xi32>
    %68 = arith.extui %67 : vector<4x128xi1> to vector<4x128xi32>
    %69 = arith.sitofp %68 : vector<4x128xi32> to vector<4x128xf32>
    %70 = vector.extract_strided_slice %9 {offsets = [2, 0], sizes = [1, 128], strides = [1, 1]} : vector<3x128xi32> to vector<1x128xi32>
    %71 = vector.broadcast %70 : vector<1x128xi32> to vector<4x128xi32>
    %72 = arith.cmpi eq, %59, %71 : vector<4x128xi32>
    %73 = arith.extui %72 : vector<4x128xi1> to vector<4x128xi32>
    %74 = arith.sitofp %73 : vector<4x128xi32> to vector<4x128xf32>
    %75 = tpu.concatenate %64, %69, %74 in 0 : vector<4x128xf32>, vector<4x128xf32>, vector<4x128xf32> -> vector<12x128xf32>
    %76 = arith.mulf %75, %47 : vector<12x128xf32>
    %cst_10 = arith.constant dense<0.000000e+00> : vector<128xf32>
    %77 = vector.multi_reduction <add>, %76, %cst_10 [0] : vector<12x128xf32> to vector<128xf32>
    %78 = vector.shape_cast %77 : vector<128xf32> to vector<1x128xf32>
    %cst_11 = arith.constant 0.899999976 : f32
    %79 = vector.broadcast %cst_11 : f32 to vector<1x128xf32>
    %80 = arith.mulf %79, %58 : vector<1x128xf32>
    %81 = arith.addf %11, %80 : vector<1x128xf32>
    %82 = arith.subf %81, %78 : vector<1x128xf32>
    %83 = tpu.iota {dimensions = array<i32: 1>} : vector<1x128xi32>
    %c1_i32 = arith.constant 1 : i32
    %84 = arith.muli %arg0, %c1_i32 : i32
    %85 = arith.addi %84, %arg1 : i32
    %c128_i32 = arith.constant 128 : i32
    %86 = arith.muli %85, %c128_i32 : i32
    %87 = vector.broadcast %86 : i32 to vector<1x128xi32>
    %88 = arith.addi %87, %83 : vector<1x128xi32>
    %c8_i32 = arith.constant 8 : i32
    %89 = vector.broadcast %c8_i32 : i32 to vector<1x128xi32>
    %90 = arith.cmpi slt, %88, %89 : vector<1x128xi32>
    %cst_12 = arith.constant 5.000000e-01 : f32
    %91 = vector.broadcast %cst_12 : f32 to vector<1x128xf32>
    %92 = arith.mulf %91, %82 : vector<1x128xf32>
    %cst_13 = arith.constant -2.07944155 : f32
    %93 = vector.broadcast %cst_13 : f32 to vector<1x128xf32>
    %94 = arith.addf %92, %93 : vector<1x128xf32>
    %cst_14 = arith.constant -1.000000e+30 : f32
    %95 = vector.broadcast %cst_14 : f32 to vector<1x128xf32>
    %96 = arith.select %90, %94, %95 : vector<1x128xi1>, vector<1x128xf32>
    %c0_15 = arith.constant 0 : index
    %c0_16 = arith.constant 0 : index
    %97 = vector.load %arg6[%c0_15, %c0_16] : memref<1x128xf32, #tpu.memory_space<vmem>>, vector<1x128xf32>
    %98 = arith.maximumf %97, %96 : vector<1x128xf32>
    %c0_17 = arith.constant 0 : index
    %c0_18 = arith.constant 0 : index
    %99 = vector.load %arg7[%c0_17, %c0_18] : memref<1x128xf32, #tpu.memory_space<vmem>>, vector<1x128xf32>
    %100 = arith.subf %97, %98 : vector<1x128xf32>
    %101 = math.exp %100 : vector<1x128xf32>
    %102 = arith.mulf %99, %101 : vector<1x128xf32>
    %103 = arith.subf %96, %98 : vector<1x128xf32>
    %104 = math.exp %103 : vector<1x128xf32>
    %105 = arith.addf %102, %104 : vector<1x128xf32>
    %c0_19 = arith.constant 0 : index
    %c0_20 = arith.constant 0 : index
    %106 = vector.load %arg7[%c0_19, %c0_20] : memref<1x128xf32, #tpu.memory_space<vmem>>, vector<1x128xf32>
    tpu.vector_store %arg7[%c0_19, %c0_20], %105 {strides = array<i32>} : memref<1x128xf32, #tpu.memory_space<vmem>>, vector<1x128xf32>,
    %c0_21 = arith.constant 0 : index
    %c0_22 = arith.constant 0 : index
    %107 = vector.load %arg6[%c0_21, %c0_22] : memref<1x128xf32, #tpu.memory_space<vmem>>, vector<1x128xf32>
    tpu.vector_store %arg6[%c0_21, %c0_22], %98 {strides = array<i32>} : memref<1x128xf32, #tpu.memory_space<vmem>>, vector<1x128xf32>,
    %c0_i32_23 = arith.constant 0 : i32
    %108 = arith.cmpi eq, %arg1, %c0_i32_23 : i32
    %109 = arith.extui %108 : i1 to i32
    %c0_i32_24 = arith.constant 0 : i32
    %110 = arith.cmpi ne, %109, %c0_i32_24 : i32
    scf.if %110 {
      %c0_25 = arith.constant 0 : index
      %c0_26 = arith.constant 0 : index
      %111 = vector.load %arg6[%c0_25, %c0_26] : memref<1x128xf32, #tpu.memory_space<vmem>>, vector<1x128xf32>
      %cst_27 = arith.constant dense<0xFF800000> : vector<1xf32>
      %112 = vector.multi_reduction <maximumf>, %111, %cst_27 [1] : vector<1x128xf32> to vector<1xf32>
      %113 = vector.shape_cast %112 : vector<1xf32> to vector<1x1xf32>
      %c0_28 = arith.constant 0 : index
      %c0_29 = arith.constant 0 : index
      %114 = vector.load %arg7[%c0_28, %c0_29] : memref<1x128xf32, #tpu.memory_space<vmem>>, vector<1x128xf32>
      %115 = vector.broadcast %113 : vector<1x1xf32> to vector<1x128xf32>
      %116 = arith.subf %111, %115 : vector<1x128xf32>
      %117 = math.exp %116 : vector<1x128xf32>
      %118 = arith.mulf %114, %117 : vector<1x128xf32>
      %cst_30 = arith.constant dense<0.000000e+00> : vector<1xf32>
      %119 = vector.multi_reduction <add>, %118, %cst_30 [1] : vector<1x128xf32> to vector<1xf32>
      %120 = vector.shape_cast %119 : vector<1xf32> to vector<1x1xf32>
      %121 = math.log %120 : vector<1x1xf32>
      %122 = arith.addf %113, %121 : vector<1x1xf32>
      %123 = vector.shape_cast %122 : vector<1x1xf32> to vector<1x1xf32>
      %124 = vector.broadcast %123 : vector<1x1xf32> to vector<8x128xf32>
      %c0_31 = arith.constant 0 : index
      %c0_32 = arith.constant 0 : index
      %125 = vector.load %arg5[%c0_31, %c0_32] : memref<8x128xf32, #tpu.memory_space<vmem>>, vector<8x128xf32>
      tpu.vector_store %arg5[%c0_31, %c0_32], %124 {strides = array<i32>} : memref<8x128xf32, #tpu.memory_space<vmem>>, vector<8x128xf32>,
    } else {
    }
    return
  }
  func.func @transform_0(%arg0: i32, %arg1: i32) -> (i32, i32) {
    %c0_i32 = arith.constant 0 : i32
    %c0_i32_0 = arith.constant 0 : i32
    %c0_i32_1 = arith.constant 0 : i32
    return %c0_i32, %c0_i32_0 : i32, i32
  }
  func.func @transform_1(%arg0: i32, %arg1: i32) -> (i32, i32) {
    %c1_i32 = arith.constant 1 : i32
    %0 = arith.muli %arg0, %c1_i32 : i32
    %1 = arith.addi %0, %arg1 : i32
    %c0_i32 = arith.constant 0 : i32
    %c0_i32_0 = arith.constant 0 : i32
    return %c0_i32, %1 : i32, i32
  }
  func.func @transform_2(%arg0: i32, %arg1: i32) -> (i32, i32) {
    %c1_i32 = arith.constant 1 : i32
    %0 = arith.muli %arg0, %c1_i32 : i32
    %1 = arith.addi %0, %arg1 : i32
    %c0_i32 = arith.constant 0 : i32
    %c0_i32_0 = arith.constant 0 : i32
    return %c0_i32, %1 : i32, i32
  }
  func.func @transform_3(%arg0: i32, %arg1: i32) -> (i32, i32) {
    %c0_i32 = arith.constant 0 : i32
    %c0_i32_0 = arith.constant 0 : i32
    return %c0_i32, %arg0 : i32, i32
  }
}

</mosaic_0001>

<bundles_post_ra>
// kernel: tpu_custom_call.1
= control target key start
LH: loop header
LB: loop body
LE: loop exit
PB: predicated region body
PF: predicated region fallthrough
CT: control target
= control target key end

     0   :  { %8 = vsyncpa [#allocation5], 0  ;;  %s645_s0 = inlined_call_operand.hbm [shape: f32[16,96], index: 0, kind: input, shape index: {}]   ;;  %s646_s1 = inlined_call_operand.hbm [shape: s32[9,128], index: 1, kind: input, shape index: {}]   ;;  %s647_s2 = inlined_call_operand.vmem [shape: f32[1,128], index: 2, kind: input, shape index: {}]   ;;  %s648_s3 = inlined_call_operand.hbm [shape: f32[8,128], index: 3, kind: output, shape index: {}]  }
   0x1   :  { %9 = vsyncpa [#allocation8], 0 }
   0x2   :  { %10 = vsyncpa [#allocation6], 0  ;;  %s539_s12 = smov [#allocation4]   ;;  %s467_s16 = scalar_lea.hbm %s645_s0, 256 }
   0x3   :  { %s16_s13 = sshll.u32 %s539_s12, 4  ;;  %p468_p0 = scmp.ne.s32.totalorder %s645_s0, %s467_s16  ;;  %s17_s13 = int_to_ptr.vmem [resolvable:$true] %s16_s13 }
   0x4   :  { %p471_p1 = scmp.lt.u32.totalorder %s467_s16, %s645_s0 }
   0x6   :  { %p473_p2 = pnand %p471_p1, %p468_p0 }
   0x8   :  { %476 = shalt.err (!%p473_p2)
}
   0x9   :  { %s477_s21 = scalar_lea.vmem %s17_s13, 256  ;;  %p482_p4 = scmp.lt.s32.totalorder %s17_s13, %s17_s13 }
   0xa   :  { %p478_p3 = scmp.ne.s32.totalorder %s17_s13, %s477_s21  ;;  %p483_p5 = scmp.lt.s32.totalorder %s477_s21, %s477_s21 }
   0xc   :  { %p484_p6 = por %p483_p5, %p482_p4 }
   0xe   :  { %p485_p7 = pnand %p484_p6, %p478_p3 }
  0x10   :  { %488 = shalt.err (!%p485_p7)
}
  0x11   :  { %s540_s22 = smov 128   ;;  %s541_s23 = smov 8  }
  0x12   :  { %22 = dma.hbm_to_vmem [thread:$0]  %s645_s0, 256, %s17_s13, [#allocation5], %s540_s22, %s540_s22, %s541_s23  }
  0x13   :  { %s542_s26 = smov [#allocation7]   ;;  %s489_s30 = scalar_lea.hbm %s646_s1, 256 }
  0x14   :  { %s31_s27 = sshll.u32 %s542_s26, 4  ;;  %p490_p8 = scmp.ne.s32.totalorder %s646_s1, %s489_s30  ;;  %s32_s27 = int_to_ptr.vmem [resolvable:$true] %s31_s27 }
  0x15   :  { %p493_p9 = scmp.lt.u32.totalorder %s489_s30, %s646_s1 }
  0x17   :  { %p495_p10 = pnand %p493_p9, %p490_p8 }
  0x19   :  { %498 = shalt.err (!%p495_p10)
}
  0x1a   :  { %s499_s8 = scalar_lea.vmem %s32_s27, 256  ;;  %p504_p12 = scmp.lt.s32.totalorder %s32_s27, %s32_s27 }
  0x1b   :  { %p500_p11 = scmp.ne.s32.totalorder %s32_s27, %s499_s8  ;;  %p505_p13 = scmp.lt.s32.totalorder %s499_s8, %s499_s8 }
  0x1d   :  { %p506_p0 = por %p505_p13, %p504_p12 }
  0x1f   :  { %p507_p1 = pnand %p506_p0, %p500_p11 }
  0x21   :  { %510 = shalt.err (!%p507_p1)
}
  0x22   :  { %37 = dma.hbm_to_vmem [thread:$0]  %s646_s1, 256, %s32_s27, [#allocation8], %s540_s22, %s540_s22, %s541_s23  }
  0x23   :  { %533 = dma.done.wait [#allocation5], 256  }
  0x24   :  { %534 = vsyncadd [#allocation5], 4294967040 }
  0x25   :  { %535 = dma.done.wait [#allocation8], 256  }
  0x26   :  { %536 = vsyncadd [#allocation8], 4294967040  ;;  %v72_v0 = vlaneseq  ;;  %v543_v1 = vmov 0.0   ;;  %vm137_vm0 = vcmask 785408   ;;  %v67_v6 = vld [vmem:[#allocation7] sm:$0xff]  ;;  %v135_v7 = vld [vmem:[#allocation4] sm:$0xff] }
  0x27   :  { %66 = vst [vmem:[#allocation3] sm:$0x1] %v543_v1  ;;  %420 = vmatprep.mubr.msk.f32.mxu0 %vm137_vm0, %v135_v7  ;;  %v356_v11 = vld [vmem:[#allocation7 + $0x8] ss:$0 sm:$0xff]  ;;  %v544_v12 = vmov 1.0|1.0  }
  0x28   :  { %v593_v2 = vshrl.u32 %v72_v0, 7  ;;  %v136_v18 = vld [vmem:[#allocation4 + $0x8] sm:$0xff]  ;;  %v545_v19 = vmov -1e+30  }
  0x29   :  { %65 = vst [vmem:[#allocation2] sm:$0x1] %v545_v19 }
  0x2a   :  { %v77_v3 = vsub.s32 6, %v593_v2  ;;  %v87_v4 = vsub.s32 7, %v593_v2  ;;  %v74_v5 = vadd.s32 8, %v593_v2  ;;  %v107_v10 = vsub.s32 0, %v593_v2 }
  0x2b   :  { %vm99_vm7 = vcmp.eq.s32.totalorder %v593_v2, %v356_v11  ;;  %v117_v14 = vsub.s32 1, %v593_v2  ;;  %v127_v16 = vsub.s32 2, %v593_v2  ;;  %v250_v20 = vsub.s32 4, %v593_v2 }
  0x2c   :  { %v78_v8 = vrot.slane %v67_v6, %v77_v3  ;;  %v88_v9 = vrot.slane %v67_v6, %v87_v4  ;;  %vm100_vm8 = vcmp.eq.s32.totalorder %v74_v5, %v356_v11  ;;  %v108_v13 = vrot.slane %v67_v6, %v107_v10 }
  0x2d   :  { %vm431_vm9 = vmpackc.low %vm100_vm8, %vm99_vm7  ;;  %v118_v15 = vrot.slane %v67_v6, %v117_v14  ;;  %v128_v17 = vrot.slane %v67_v6, %v127_v16  ;;  %v243_v22 = vsub.s32 3, %v593_v2  ;;  %v257_v24 = vsub.s32 5, %v593_v2 }
  0x2e   :  { %vm79_vm1 = vcmp.eq.s32.totalorder %v593_v2, %v78_v8  ;;  %vm80_vm2 = vcmp.eq.s32.totalorder %v74_v5, %v78_v8  ;;  %vm89_vm3 = vcmp.eq.s32.totalorder %v593_v2, %v88_v9  ;;  %vm90_vm4 = vcmp.eq.s32.totalorder %v74_v5, %v88_v9 }
  0x2f   :  { %vm423_vm5 = vmpackc.low %vm80_vm2, %vm79_vm1  ;;  %vm109_vm10 = vcmp.eq.s32.totalorder %v593_v2, %v108_v13  ;;  %vm110_vm11 = vcmp.eq.s32.totalorder %v74_v5, %v108_v13  ;;  %vm119_vm13 = vcmp.eq.s32.totalorder %v593_v2, %v118_v15  ;;  %vm120_vm14 = vcmp.eq.s32.totalorder %v74_v5, %v118_v15 }
  0x30   :  { %424 = vmatprep.subr.msk.bf16.mxu0 %vm423_vm5, %v544_v12  ;;  %vm427_vm6 = vmpackc.low %vm90_vm4, %vm89_vm3  ;;  %vm129_vm1 = vcmp.eq.s32.totalorder %v593_v2, %v128_v17  ;;  %vm130_vm2 = vcmp.eq.s32.totalorder %v74_v5, %v128_v17  ;;  %vm69_vm4 = vcmp.eq.s32.totalorder %v67_v6, 4294967295  ;;  %vm219_vm7 = vcmask 1043456   ;;  %v71_v5 = vld [vmem:[%s647_s2] sm:$0x1]  ;;  %s546_s2 = smov [#allocation9]  }
  0x31   :  { %426 = vmatpush3.bf16.msk.msra.mxu0 %vm423_vm5, %v544_v12  ;;  %vm435_vm12 = vmpackc.low %vm110_vm11, %vm109_vm10  ;;  %v70_v21 = vsel %vm69_vm4, 0, %v67_v6  ;;  %v287_v9 = vand.u32 127, %v72_v0  ;;  %v296_v14 = vld [vmem:[#allocation2] sm:$0x1]  ;;  %v298_v0 = vld [vmem:[#allocation3] sm:$0x1] }
  0x32   :  { %428 = vmatprep.subr.msk.bf16.mxu0 %vm427_vm6, %v544_v12  ;;  %vm439_vm15 = vmpackc.low %vm120_vm14, %vm119_vm13  ;;  %v251_v23 = vrot.slane %v70_v21, %v250_v20  ;;  %v244_v25 = vrot.slane %v70_v21, %v243_v22  ;;  %v258_v26 = vrot.slane %v70_v21, %v257_v24  ;;  %s339_s11 = sshll.u32 %s546_s2, 4  ;;  %s340_s11 = int_to_ptr.vmem [resolvable:$true] %s339_s11 }
  0x33   :  { %vm443_vm3 = vmpackc.low %vm130_vm2, %vm129_vm1  ;;  %vm292_vm8 = vcmp.lt.s32.totalorder %v287_v9, 8  ;;  %s511_s12 = scalar_lea.vmem %s340_s11, 128  ;;  %p516_p3 = scmp.lt.s32.totalorder %s340_s11, %s340_s11 }
  0x34   :  { %vm252_vm5 = vcmp.eq.s32.totalorder %v593_v2, %v251_v23  ;;  %p512_p2 = scmp.ne.s32.totalorder %s340_s11, %s511_s12  ;;  %p517_p4 = scmp.lt.s32.totalorder %s511_s12, %s511_s12 }
  0x35   :  { %430 = vmatpush3.bf16.msk.msra.mxu0 %vm427_vm6, %v544_v12  ;;  %v380_v27 = vsel %vm252_vm5, 1.0, %v543_v1  ;;  %vm245_vm6 = vcmp.eq.s32.totalorder %v593_v2, %v244_v25 }
  0x36   :  { %432 = vmatprep.subr.msk.bf16.mxu0 %vm431_vm9, %v544_v12  ;;  %v263_v28 = vrot.slane %v380_v27, 4  ;;  %v379_v29 = vsel %vm245_vm6, 1.0, %v543_v1  ;;  %p518_p5 = por %p517_p4, %p516_p3 }
  0x38   :  { %v265_v35 = vsel %vm219_vm7, %v379_v29, %v263_v28  ;;  %p519_p6 = pnand %p518_p5, %p512_p2 }
  0x39   :  { %434 = vmatpush3.bf16.msk.msra.mxu0 %vm431_vm9, %v544_v12  ;;  %vm313_vm9 = vcmask 1040384  }
  0x3a   :  { %436 = vmatprep.subr.msk.bf16.mxu0 %vm435_vm12, %v544_v12 }
  0x3d   :  { %438 = vmatpush3.bf16.msk.msra.mxu0 %vm435_vm12, %v544_v12 }
  0x3e   :  { %440 = vmatprep.subr.msk.bf16.mxu0 %vm439_vm15, %v544_v12 }
  0x41   :  { %442 = vmatpush3.bf16.msk.msra.mxu0 %vm439_vm15, %v544_v12 }
  0x42   :  { %444 = vmatprep.subr.msk.bf16.mxu0 %vm443_vm3, %v544_v12 }
  0x45   :  { %446 = vmatpush3.bf16.msk.msra.mxu0 %vm443_vm3, %v544_v12 }
  0x48   :  { %421 = vmatmul.mubr.msk.f32.vlgmr.msra.gmra.mrb[0].mxu0 %vm137_vm0, %v136_v18  ;;  %vm259_vm0 = vcmp.eq.s32.totalorder %v593_v2, %v258_v26 }
  0x49   :  { %v381_v31 = vsel %vm259_vm0, 1.0, %v543_v1 }
 0x11b   :  { %v422_v30 = vpop.f32.mrb[0].mxu0 }
 0x11c   :  { %v269_v32 = vrot.slane %v422_v30, 4  ;;  %v210_v33 = vpop.f32.mrb[1].mxu0 }
 0x11d   :  { %v220_v34 = vsel %vm219_vm7, %v210_v33, -inf  ;;  %v268_v36 = vrot.slane %v210_v33, 4 }
 0x11e   :  { %v274_v37 = vmul.f32 %v381_v31, %v269_v32  ;;  %v221_v38 = vrot.slane %v220_v34, 4 }
 0x11f   :  { %v270_v39 = vsel %vm219_vm7, %v268_v36, %v269_v32 }
 0x120   :  { %v275_v40 = vsel %vm219_vm7, %v274_v37, 0.0  ;;  %v222_v41 = vmax.f32 %v220_v34, %v221_v38  ;;  %v273_v42 = vmul.f32 %v270_v39, %v265_v35 }
 0x122   :  { %v223_v43 = vrot.slane %v222_v41, 2  ;;  %v276_v44 = vadd.f32 %v275_v40, %v273_v42 }
 0x124   :  { %v224_v45 = vmax.f32 %v222_v41, %v223_v43  ;;  %v277_v58 = vrot.slane %v276_v44, 4 }
 0x126   :  { %v225_v46 = vrot.slane %v224_v45, 1  ;;  %v278_v59 = vadd.f32 %v277_v58, %v276_v44 }
 0x128   :  { %v226_v47 = vmax.f32 %v224_v45, %v225_v46  ;;  %v279_v60 = vrot.slane %v278_v59, 2 }
 0x12a   :  { %v227_v48 = vsub.f32 %v210_v33, %v226_v47  ;;  %v280_v63 = vadd.f32 %v279_v60, %v278_v59 }
 0x12c   :  { %v228_v49 = vmul.f32 1.442695, %v227_v48  ;;  %v281_v4 = vrot.slane %v280_v63, 1 }
 0x12e   :  { %455 = vpow2.f32 %v228_v49  ;;  %v282_v7 = vadd.f32 %v281_v4, %v280_v63 }
 0x138   :  { %v456_v50 = vpop.eup %455 }
 0x139   :  { %v230_v51 = vsel %vm219_vm7, %v456_v50, 0.0 }
 0x13a   :  { %v231_v52 = vrot.slane %v230_v51, 4 }
 0x13c   :  { %v232_v53 = vadd.f32 %v231_v52, %v230_v51 }
 0x13e   :  { %v233_v54 = vrot.slane %v232_v53, 2 }
 0x140   :  { %v234_v55 = vadd.f32 %v233_v54, %v232_v53 }
 0x142   :  { %v235_v56 = vrot.slane %v234_v55, 1 }
 0x144   :  { %v236_v57 = vadd.f32 %v235_v56, %v234_v55 }
 0x146   :  { %457 = vlog2.f32 %v236_v57 }
 0x150   :  { %v458_v61 = vpop.eup %457 }
 0x151   :  { %v238_v62 = vmul.f32 0.6931472, %v458_v61 }
 0x153   :  { %v239_v1 = vadd.f32 %v238_v62, %v226_v47 }
 0x155   :  { %v240_v3 = vmul.f32 0.5, %v239_v1 }
 0x157   :  { %v283_v6 = vmul.f32 0.9, %v240_v3 }
 0x159   :  { %v284_v8 = vadd.f32 %v283_v6, %v71_v5 }
 0x15b   :  { %v285_v11 = vsub.f32 %v284_v8, %v282_v7 }
 0x15d   :  { %v293_v12 = vmul.f32 0.5, %v285_v11 }
 0x15f   :  { %v294_v13 = vadd.f32 -2.0794415, %v293_v12 }
 0x161   :  { %v295_v15 = vsel %vm292_vm8, %v294_v13, -1e+30 }
 0x162   :  { %v297_v16 = vmax.f32 %v296_v14, %v295_v15 }
 0x164   :  { %v299_v17 = vsub.f32 %v296_v14, %v297_v16  ;;  %v303_v18 = vsub.f32 %v295_v15, %v297_v16  ;;  %308 = vst [vmem:[#allocation2] sm:$0x1] %v297_v16 }
 0x166   :  { %v300_v19 = vmul.f32 1.442695, %v299_v17  ;;  %v304_v20 = vmul.f32 1.442695, %v303_v18 }
 0x168   :  { %459 = vpow2.f32 %v300_v19 }
 0x169   :  { %461 = vpow2.f32 %v304_v20 }
 0x16b   :  { %v312_v21 = vld [vmem:[#allocation2] sm:$0x1] }
 0x16c   :  { %v314_v22 = vsel %vm313_vm9, %v312_v21, -inf }
 0x16d   :  { %315 = vmax.xlane.f32.xlu0 %v314_v22 }
 0x172   :  { %v460_v23 = vpop.eup %459 }
 0x173   :  { %v302_v24 = vmul.f32 %v460_v23, %v298_v0  ;;  %v462_v25 = vpop.eup %461 }
 0x175   :  { %v306_v26 = vadd.f32 %v462_v25, %v302_v24 }
 0x177   :  { %307 = vst [vmem:[#allocation3] sm:$0x1] %v306_v26 }
 0x17e   :  { %v317_v31 = vld [vmem:[#allocation3] sm:$0x1] }
 0x1fa   :  { %v316_v27 = vpop.xlane.xlu0 %315 }
 0x1fb   :  { %v318_v28 = vsub.f32 %v312_v21, %v316_v27 }
 0x1fd   :  { %v319_v29 = vmul.f32 1.442695, %v318_v28 }
 0x1ff   :  { %463 = vpow2.f32 %v319_v29 }
 0x209   :  { %v464_v30 = vpop.eup %463 }
 0x20a   :  { %v321_v32 = vmul.f32 %v464_v30, %v317_v31 }
 0x20c   :  { %v322_v33 = vsel %vm313_vm9, %v321_v32, 0.0 }
 0x20d   :  { %323 = vadd.xlane.f32.xlu0 %v322_v33 }
 0x29a   :  { %v324_v34 = vpop.xlane.xlu0 %323 }
 0x29b   :  { %465 = vlog2.f32 %v324_v34 }
 0x2a5   :  { %v466_v35 = vpop.eup %465 }
 0x2a6   :  { %v326_v36 = vmul.f32 0.6931472, %v466_v35 }
 0x2a8   :  { %v327_v37 = vadd.f32 %v326_v36, %v316_v27 }
 0x2aa   :  { %v331_v38 = vrot.slane %v327_v37, %v107_v10 }
 0x2ac   :  { %332 = vst [vmem:[#allocation9] sm:$0xff] %v331_v38 }
 0x2ad   :  { %522 = shalt.err (!%p519_p6)
}
 0x2ae   :  { %s523_s15 = scalar_lea.hbm %s648_s3, 128 }
 0x2af   :  { %p524_p7 = scmp.ne.s32.totalorder %s648_s3, %s523_s15  ;;  %p527_p8 = scmp.lt.u32.totalorder %s523_s15, %s648_s3 }
 0x2b1   :  { %p529_p9 = pnand %p527_p8, %p524_p7 }
 0x2b3   :  { %532 = shalt.err (!%p529_p9)
}
 0x2b4   :  { %342 = dma.vmem_to_hbm [thread:$0]  %s340_s11, 128, %s648_s3, [#allocation6]  }
 0x2b5   :  { %537 = dma.done.wait [#allocation6], 128  }
 0x2b6   :  { %538 = vsyncadd [#allocation6], 4294967168 }
 0x2b7   :  { %346 = vsyncpa [#allocation5], 1 }
 0x2b8   :  { %347 = vsyncpa [#allocation8], 1 }
 0x2b9   :  { %348 = vsyncpa [#allocation6], 1 }

</bundles_post_ra>
